<compile_context>
chip_gen: v7x
topology: tpu7x:2x2x1
jax: 0.10.0
libtpu: 0.0.40
codegen_flags: <defaults>
</compile_context>

<pallas_src>
import functools

import jax
import jax.numpy as jnp
from jax.experimental import pallas as pl
from jax.experimental.pallas import tpu as pltpu


def _round_up(x, m):
    return ((x + m - 1) // m) * m


def _vmem_capacity_bytes():
    """Generation-aware VMEM capacity (v5e/v6e: 128 MiB, v7x: 64 MiB per TC)."""
    try:
        return int(pltpu.get_tpu_info().vmem_capacity_bytes)
    except Exception:
        return 64 * 2 ** 20          # safe lower bound (v7x per-TensorCore VMEM)


def _choose_row_tile(nhw, kpad, ct, budget_bytes):
    """Largest power-of-two row tile whose kernel-A working set fits the budget."""
    # Per-row cost: double-buffered bf16 patch tile + double-buffered bf16 conv
    # tile + ~3 f32-sized temporaries (acc, acc^2, reduction headroom).
    per_row = 2 * kpad * 2 + 2 * ct * 2 + 3 * ct * 4
    fixed = 2 * kpad * ct * 2 + 4 * 2 * ct * 4 + (2 << 20)
    rt_cap = max(8, (budget_bytes - fixed) // per_row)
    rt = 8
    while rt * 2 <= min(rt_cap, 4096):
        rt *= 2
    return int(min(rt, _round_up(nhw, 8)))


# ------------------------------- kernels ----------------------------------- #

def _conv_stats_kernel(p_ref, w_ref, conv_ref, stats_ref):
    """One (row-tile, channel-tile): implicit-GEMM conv + per-tile BN partial sums.

    p_ref:     (rt, Kpad)   bf16 folded im2col patches
    w_ref:     (Kpad, ct)   bf16 folded conv weights
    conv_ref:  (rt, ct)     bf16 conv activation (pre-BN)
    stats_ref: (1, 2, ct)   f32 [sum, sum-of-squares] over this row tile
    """
    # Single wide-K MXU matmul (implicit-GEMM convolution), f32 accumulation.
    acc = jnp.dot(p_ref[...], w_ref[...], preferred_element_type=jnp.float32)
    conv_ref[...] = acc.astype(conv_ref.dtype)
    # Per-row-tile partial statistics (padded rows are exact zeros since the
    # conv has no bias, so they contribute nothing).
    s = jnp.sum(acc, axis=0, keepdims=True)             # (1, ct)
    ss = jnp.sum(acc * acc, axis=0, keepdims=True)      # (1, ct)
    stats_ref[...] = jnp.concatenate([s, ss], axis=0)[None]


def _bn_relu_kernel(conv_ref, scale_ref, shift_ref, out_ref, *, leaky):
    """Fused BatchNorm affine (globally folded scale/shift) + (Leaky)ReLU."""
    y = conv_ref[...].astype(jnp.float32) * scale_ref[...] + shift_ref[...]
    if leaky == 0.0:          # `leaky` is a static Python float
        y = jnp.maximum(y, 0.0)
    else:
        y = jnp.where(y >= 0.0, y, leaky * y)
    out_ref[...] = y.astype(out_ref.dtype)


# ------------------------------- wrapper ----------------------------------- #

def discriminator_conv_block(x_nchw, params, *, kernel_size, padding,
                             eps=1e-5, relu_type="normal",
                             compute_dtype=jnp.bfloat16,
                             out_dtype=jnp.bfloat16):
    """NCHW in / NCHW out. stride is fixed to 2 (as in the PyTorch module)."""
    N, Cin, H, W = x_nchw.shape
    w = params["w"]                                     # (k, k, Cin, Cout)
    k = kernel_size
    stride = 2
    Cout = w.shape[-1]
    Ho = (H + 2 * padding - k) // stride + 1
    Wo = (W + 2 * padding - k) // stride + 1
    NHW = N * Ho * Wo
    K = k * k * Cin
    leaky = 0.2 if relu_type == "leaky" else 0.0

    # ---- layout plumbing (pure gathers/reshapes, no FLOPs), bf16-first -------
    # TODO(synk): fuse the im2col into kernel A (k^2 shifted strided DMA slices
    # from an NHWC row tile) so activations are read from HBM exactly once.
    x = jnp.transpose(x_nchw, (0, 2, 3, 1)).astype(compute_dtype)   # NCHW->NHWC
    xp = jnp.pad(x, ((0, 0), (padding, padding), (padding, padding), (0, 0)))
    taps = [xp[:, dy:dy + stride * (Ho - 1) + 1:stride,
               dx:dx + stride * (Wo - 1) + 1:stride, :]
            for dy in range(k) for dx in range(k)]                  # k*k x (N,Ho,Wo,Cin)
    patches = jnp.concatenate(taps, axis=-1).reshape(NHW, K)        # (NHW, K) bf16

    # Fold conv weights to the same (dy, dx, cin) tap order; pad K and Cout so
    # the MXU K axis is full and all loads/stores are unmasked 128-lane wide.
    Kpad = _round_up(K, 128)
    Cp = _round_up(Cout, 128)
    w_folded = jnp.pad(w.reshape(K, Cout).astype(compute_dtype),
                       ((0, Kpad - K), (0, Cp - Cout)))             # (Kpad, Cp)
    gamma = jnp.pad(params["g"].astype(jnp.float32), (0, Cp - Cout)).reshape(1, Cp)
    beta = jnp.pad(params["beta"].astype(jnp.float32), (0, Cp - Cout)).reshape(1, Cp)
    # NOTE: params["b"] (conv bias) is intentionally NOT applied: under
    # training-mode BatchNorm a per-channel pre-norm constant cancels exactly.

    # ---- generation-aware tiling ---------------------------------------------
    # ct=256 exploits the 2x256^2 MXUs on v6e/v7x (only kicks in for Cout>=256);
    # on v5e (128x128 MXU) ct=128 would be kept — Cout=128 here keeps ct=128.
    ct = 256 if Cp % 256 == 0 else 128
    capacity = _vmem_capacity_bytes()
    vmem_limit = int(min(capacity * 3 // 4, 100 * 2 ** 20))  # ~48 MiB v7x, ~96 MiB v5e/v6e
    rt = _choose_row_tile(NHW, Kpad, ct, vmem_limit - (4 << 20))
    NHWp = _round_up(NHW, rt)

    patches = jnp.pad(patches, ((0, NHWp - NHW), (0, Kpad - K)))    # (NHWp, Kpad)
    num_rt = NHWp // rt
    num_ct = Cp // ct

    cparams = pltpu.CompilerParams(
        dimension_semantics=("parallel", "parallel"),
        vmem_limit_bytes=vmem_limit)

    # ---- kernel A: conv (implicit GEMM) + per-row-tile BN partial sums -------
    conv_bf16, partial_stats = pl.pallas_call(
        _conv_stats_kernel,
        out_shape=(jax.ShapeDtypeStruct((NHWp, Cp), compute_dtype),
                   jax.ShapeDtypeStruct((num_rt, 2, Cp), jnp.float32)),
        grid=(num_ct, num_rt),
        in_specs=[
            pl.BlockSpec((rt, Kpad), lambda j, r: (r, 0)),   # streams over rows
            pl.BlockSpec((Kpad, ct), lambda j, r: (0, j)),   # reused across rows
        ],
        out_specs=(
            pl.BlockSpec((rt, ct), lambda j, r: (r, j)),
            pl.BlockSpec((1, 2, ct), lambda j, r: (r, 0, j)),
        ),
        compiler_params=cparams,
    )(patches, w_folded)

    # ---- tiny f32 reduction + BN scale/shift fold (only Cout-sized work) -----
    # Batch statistics over ALL row tiles (biased variance, training-mode BN).
    # E[x^2]-E[x]^2 is well-conditioned here because the (cancelled) conv bias
    # was removed, so per-channel means are small; guard negatives anyway.
    sums = jnp.sum(partial_stats, axis=0)               # (2, Cp) f32
    inv_n = 1.0 / float(NHW)                            # padded rows contribute 0
    mu = sums[0] * inv_n
    var = jnp.maximum(sums[1] * inv_n - mu * mu, 0.0)
    scale = (gamma[0] * jax.lax.rsqrt(var + eps)).reshape(1, Cp)
    shift = (beta[0] - mu * scale[0]).reshape(1, Cp)

    # ---- kernel B: fused BN affine + (Leaky)ReLU ------------------------------
    out_flat = pl.pallas_call(
        functools.partial(_bn_relu_kernel, leaky=float(leaky)),
        out_shape=jax.ShapeDtypeStruct((NHWp, Cp), out_dtype),
        grid=(num_ct, num_rt),
        in_specs=[
            pl.BlockSpec((rt, ct), lambda j, r: (r, j)),
            pl.BlockSpec((1, ct), lambda j, r: (0, j)),
            pl.BlockSpec((1, ct), lambda j, r: (0, j)),
        ],
        out_specs=pl.BlockSpec((rt, ct), lambda j, r: (r, j)),
        compiler_params=cparams,
    )(conv_bf16, scale, shift)

    out = out_flat[:NHW, :Cout].reshape(N, Ho, Wo, Cout)
    return jnp.transpose(out, (0, 3, 1, 2))             # -> NCHW


# ------------------------------ reference ---------------------------------- #

def _reference_forward(x_nchw, params, *, kernel_size, padding, eps, leaky):
    """Plain-JAX f32 reference of the module's forward (training-mode BN)."""
    x = jnp.transpose(x_nchw, (0, 2, 3, 1)).astype(jnp.float32)
    out = jax.lax.conv_general_dilated(
        x, params["w"].astype(jnp.float32),
        window_strides=(2, 2),
        padding=[(padding, padding), (padding, padding)],
        dimension_numbers=("NHWC", "HWIO", "NHWC"))
    out = out + params["b"].reshape(1, 1, 1, -1)   # cancels under training-mode BN
    mu = jnp.mean(out, axis=(0, 1, 2), keepdims=True)
    var = jnp.mean((out - mu) ** 2, axis=(0, 1, 2), keepdims=True)
    out = ((out - mu) * jax.lax.rsqrt(var + eps)
           * params["g"].reshape(1, 1, 1, -1) + params["beta"].reshape(1, 1, 1, -1))
    out = jnp.where(out >= 0.0, out, leaky * out)
    return jnp.transpose(out, (0, 3, 1, 2))


def init_params(key, in_c, out_c, kernel_size):
    kw, kb = jax.random.split(key, 2)
    fan_in = in_c * kernel_size * kernel_size
    bound = 1.0 / (fan_in ** 0.5)
    return {
        "w": jax.random.uniform(kw, (kernel_size, kernel_size, in_c, out_c),
                                jnp.float32, -bound, bound),
        "b": jax.random.uniform(kb, (out_c,), jnp.float32, -bound, bound),
        # BatchNorm2d affine init: gamma=1, beta=0.
        "g": jnp.ones((out_c,), jnp.float32),
        "beta": jnp.zeros((out_c,), jnp.float32),
    }


if __name__ == "__main__":
    key = jax.random.PRNGKey(0)
    k_x, k_p = jax.random.split(key)

    # Typical discriminator block: 4x4 conv, stride 2, pad 1: 16x16 -> 8x8.
    N, in_c, H, W = 2, 4, 16, 16
    out_c, ksize, pad = 128, 4, 1

    x = jax.random.normal(k_x, (N, in_c, H, W), dtype=jnp.float32)
    params = init_params(k_p, in_c, out_c, ksize)

    y = discriminator_conv_block(x, params, kernel_size=ksize, padding=pad,
                                 eps=1e-5, relu_type="normal")
    y = jax.block_until_ready(y)

    assert y.shape == (N, out_c, H // 2, W // 2)

    # Sanity check against an f32 XLA reference (bf16 conv operands, bf16
    # activation intermediate and bf16 output keep this within ~1e-1 abs).
    y_ref = _reference_forward(x, params, kernel_size=ksize, padding=pad,
                               eps=1e-5, leaky=0.0)
    max_err = float(jnp.max(jnp.abs(y.astype(jnp.float32) - y_ref)))
    assert max_err < 1e-1, f"max abs err vs reference: {max_err}"

    print("KERNEL_OK")
</pallas_src>

<mosaic_0001>
module attributes {stable_mosaic.version = 11 : i64} {
  func.func @_conv_stats_kernel(%arg0: i32, %arg1: i32, %arg2: memref<128x128xbf16, #tpu.memory_space<vmem>>, %arg3: memref<128x128xbf16, #tpu.memory_space<vmem>>, %arg4: memref<128x128xbf16, #tpu.memory_space<vmem>>, %arg5: memref<1x2x128xf32, #tpu.memory_space<vmem>>) attributes {dimension_semantics = [#tpu.dimension_semantics<parallel>, #tpu.dimension_semantics<parallel>], iteration_bounds = array<i64: 1, 1>, scalar_prefetch = 0 : i64, scratch_operands = 0 : i64, tpu.core_type = #tpu.core_type<tc>, window_params = [{transform_indices = @transform_0, window_bounds = array<i64: 128, 128>}, {transform_indices = @transform_1, window_bounds = array<i64: 128, 128>}, {transform_indices = @transform_2, window_bounds = array<i64: 128, 128>}, {transform_indices = @transform_3, window_bounds = array<i64: 1, 2, 128>}]} {
    %c0 = arith.constant 0 : index
    %c0_0 = arith.constant 0 : index
    %0 = vector.load %arg2[%c0, %c0_0] : memref<128x128xbf16, #tpu.memory_space<vmem>>, vector<128x128xbf16>
    %c0_1 = arith.constant 0 : index
    %c0_2 = arith.constant 0 : index
    %1 = vector.load %arg3[%c0_1, %c0_2] : memref<128x128xbf16, #tpu.memory_space<vmem>>, vector<128x128xbf16>
    %cst = arith.constant dense<0.000000e+00> : vector<128x128xf32>
    %2 = tpu.matmul %0, %1, %cst {dimension_numbers = #tpu.dot_dimension_numbers<[1], [0], [0], [1], [0, 0, 1, 1], [], []>} : vector<128x128xbf16>, vector<128x128xbf16>, vector<128x128xf32> -> vector<128x128xf32>
    %3 = arith.truncf %2 : vector<128x128xf32> to vector<128x128xbf16>
    %c0_3 = arith.constant 0 : index
    %c0_4 = arith.constant 0 : index
    %4 = vector.load %arg4[%c0_3, %c0_4] : memref<128x128xbf16, #tpu.memory_space<vmem>>, vector<128x128xbf16>
    tpu.vector_store %arg4[%c0_3, %c0_4], %3 {strides = array<i32>} : memref<128x128xbf16, #tpu.memory_space<vmem>>, vector<128x128xbf16>,
    %cst_5 = arith.constant dense<0.000000e+00> : vector<128xf32>
    %5 = vector.multi_reduction <add>, %2, %cst_5 [0] : vector<128x128xf32> to vector<128xf32>
    %6 = vector.shape_cast %5 : vector<128xf32> to vector<1x128xf32>
    %7 = arith.mulf %2, %2 : vector<128x128xf32>
    %cst_6 = arith.constant dense<0.000000e+00> : vector<128xf32>
    %8 = vector.multi_reduction <add>, %7, %cst_6 [0] : vector<128x128xf32> to vector<128xf32>
    %9 = vector.shape_cast %8 : vector<128xf32> to vector<1x128xf32>
    %10 = tpu.concatenate %6, %9 in 0 : vector<1x128xf32>, vector<1x128xf32> -> vector<2x128xf32>
    %11 = vector.shape_cast %10 : vector<2x128xf32> to vector<1x2x128xf32>
    %c0_7 = arith.constant 0 : index
    %c0_8 = arith.constant 0 : index
    %c0_9 = arith.constant 0 : index
    %12 = vector.load %arg5[%c0_7, %c0_8, %c0_9] : memref<1x2x128xf32, #tpu.memory_space<vmem>>, vector<1x2x128xf32>
    tpu.vector_store %arg5[%c0_7, %c0_8, %c0_9], %11 {strides = array<i32>} : memref<1x2x128xf32, #tpu.memory_space<vmem>>, vector<1x2x128xf32>,
    return
  }
  func.func @transform_0(%arg0: i32, %arg1: i32) -> (i32, i32) {
    %c0_i32 = arith.constant 0 : i32
    %c0_i32_0 = arith.constant 0 : i32
    return %arg1, %c0_i32 : i32, i32
  }
  func.func @transform_1(%arg0: i32, %arg1: i32) -> (i32, i32) {
    %c0_i32 = arith.constant 0 : i32
    %c0_i32_0 = arith.constant 0 : i32
    return %c0_i32, %arg0 : i32, i32
  }
  func.func @transform_2(%arg0: i32, %arg1: i32) -> (i32, i32) {
    %c0_i32 = arith.constant 0 : i32
    return %arg1, %arg0 : i32, i32
  }
  func.func @transform_3(%arg0: i32, %arg1: i32) -> (i32, i32, i32) {
    %c0_i32 = arith.constant 0 : i32
    %c0_i32_0 = arith.constant 0 : i32
    return %arg1, %c0_i32, %arg0 : i32, i32, i32
  }
}

</mosaic_0001>

<bundles_post_ra>
// kernel: tpu_custom_call.1
= control target key start
LH: loop header
LB: loop body
LE: loop exit
PB: predicated region body
PF: predicated region fallthrough
CT: control target
= control target key end

     0   :  { %9 = vsyncpa [#allocation3], 0  ;;  %s826_s0 = inlined_call_operand.hbm [shape: bf16[128,128], index: 0, kind: input, shape index: {}]   ;;  %s827_s1 = inlined_call_operand.hbm [shape: bf16[128,128], index: 1, kind: input, shape index: {}]   ;;  %s828_s2 = inlined_call_operand.hbm [shape: bf16[128,128], index: 2, kind: output, shape index: {0}]   ;;  %s829_s3 = inlined_call_operand.hbm [shape: f32[1,2,128], index: 3, kind: output, shape index: {1}]  }
   0x1   :  { %10 = vsyncpa [#allocation6], 0 }
   0x2   :  { %11 = vsyncpa [#allocation4], 0 }
   0x3   :  { %12 = vsyncpa [#allocation9], 0  ;;  %s719_s12 = smov [#allocation2]   ;;  %s623_s16 = scalar_lea.hbm %s826_s0, 1024 }
   0x4   :  { %s18_s13 = sshll.u32 %s719_s12, 4  ;;  %p624_p0 = scmp.ne.s32.totalorder %s826_s0, %s623_s16  ;;  %s19_s13 = int_to_ptr.vmem [resolvable:$true] %s18_s13 }
   0x5   :  { %p627_p1 = scmp.lt.u32.totalorder %s623_s16, %s826_s0 }
   0x7   :  { %p629_p2 = pnand %p627_p1, %p624_p0 }
   0x9   :  { %632 = shalt.err (!%p629_p2)
}
   0xa   :  { %s633_s21 = scalar_lea.vmem %s19_s13, 1024  ;;  %p638_p4 = scmp.lt.s32.totalorder %s19_s13, %s19_s13 }
   0xb   :  { %p634_p3 = scmp.ne.s32.totalorder %s19_s13, %s633_s21  ;;  %p639_p5 = scmp.lt.s32.totalorder %s633_s21, %s633_s21 }
   0xd   :  { %p640_p6 = por %p639_p5, %p638_p4 }
   0xf   :  { %p641_p7 = pnand %p640_p6, %p634_p3 }
  0x11   :  { %644 = shalt.err (!%p641_p7)
}
  0x12   :  { %s720_s22 = smov 64   ;;  %s721_s23 = smov 4  }
  0x13   :  { %24 = dma.hbm_to_vmem [thread:$0]  %s826_s0, 1024, %s19_s13, [#allocation3], %s720_s22, %s720_s22, %s721_s23  }
  0x14   :  { %s722_s26 = smov [#allocation5]   ;;  %s645_s30 = scalar_lea.hbm %s827_s1, 1024 }
  0x15   :  { %s30_s27 = sshll.u32 %s722_s26, 4  ;;  %p646_p8 = scmp.ne.s32.totalorder %s827_s1, %s645_s30  ;;  %s31_s27 = int_to_ptr.vmem [resolvable:$true] %s30_s27 }
  0x16   :  { %p649_p9 = scmp.lt.u32.totalorder %s645_s30, %s827_s1 }
  0x18   :  { %p651_p10 = pnand %p649_p9, %p646_p8 }
  0x1a   :  { %654 = shalt.err (!%p651_p10)
}
  0x1b   :  { %s655_s8 = scalar_lea.vmem %s31_s27, 1024  ;;  %p660_p12 = scmp.lt.s32.totalorder %s31_s27, %s31_s27 }
  0x1c   :  { %p656_p11 = scmp.ne.s32.totalorder %s31_s27, %s655_s8  ;;  %p661_p13 = scmp.lt.s32.totalorder %s655_s8, %s655_s8 }
  0x1e   :  { %p662_p0 = por %p661_p13, %p660_p12 }
  0x20   :  { %p663_p1 = pnand %p662_p0, %p656_p11 }
  0x22   :  { %666 = shalt.err (!%p663_p1)
}
  0x23   :  { %36 = dma.hbm_to_vmem [thread:$0]  %s827_s1, 1024, %s31_s27, [#allocation6], %s720_s22, %s720_s22, %s721_s23  }
  0x24   :  { %711 = dma.done.wait [#allocation3], 1024  }
  0x25   :  { %712 = vsyncadd [#allocation3], 4294966272 }
  0x26   :  { %713 = dma.done.wait [#allocation6], 1024  }
  0x27   :  { %714 = vsyncadd [#allocation6], 4294966272  ;;  %v607_v0 = vld [vmem:[#allocation5] sm:$0xff]   ;;  %v608_v1 = vld [vmem:[#allocation5 + $0x8] sm:$0xff]   ;;  %s723_s1 = smov [#allocation7]  }
  0x28   :  { %553 = vmatprep.subr.bf16.mxu0 %v607_v0  ;;  %585 = vmatprep.subr.bf16.mxu1 %v607_v0  ;;  %v609_v2 = vld [vmem:[#allocation5 + $0x10] sm:$0xff]   ;;  %v610_v3 = vld [vmem:[#allocation5 + $0x18] sm:$0xff]   ;;  %v615_v4 = vld [vmem:[#allocation2] sm:$0xff]   ;;  %s415_s10 = sshll.u32 %s723_s1, 4  ;;  %s416_s10 = int_to_ptr.vmem [resolvable:$true] %s415_s10 }
  0x29   :  { %554 = vmatpush3.bf16.msra.mxu0 %v607_v0  ;;  %593 = vmatpush3.bf16.msra.mxu1 %v607_v0  ;;  %v611_v5 = vld [vmem:[#allocation5 + $0x20] sm:$0xff]   ;;  %v612_v7 = vld [vmem:[#allocation5 + $0x28] sm:$0xff]   ;;  %v613_v8 = vld [vmem:[#allocation5 + $0x30] sm:$0xff]   ;;  %s667_s11 = scalar_lea.vmem %s416_s10, 1024  ;;  %p672_p3 = scmp.lt.s32.totalorder %s416_s10, %s416_s10 }
  0x2a   :  { %555 = vmatprep.subr.bf16.mxu0 %v608_v1  ;;  %586 = vmatprep.subr.bf16.mxu1 %v608_v1  ;;  %v619_v6 = vld [vmem:[#allocation2 + $0x20] sm:$0xff]   ;;  %v614_v9 = vld [vmem:[#allocation5 + $0x38] sm:$0xff]   ;;  %v616_v10 = vld [vmem:[#allocation2 + $0x8] sm:$0xff]   ;;  %p668_p2 = scmp.ne.s32.totalorder %s416_s10, %s667_s11  ;;  %p673_p4 = scmp.lt.s32.totalorder %s667_s11, %s667_s11 }
  0x2b   :  { %569 = vmatprep.mubr.bf16.mxu0 %v615_v4  ;;  %577 = vmatprep.mubr.bf16.mxu1 %v619_v6  ;;  %v620_v11 = vld [vmem:[#allocation2 + $0x28] sm:$0xff]   ;;  %v617_v12 = vld [vmem:[#allocation2 + $0x10] sm:$0xff]   ;;  %v618_v14 = vld [vmem:[#allocation2 + $0x18] sm:$0xff]  }
  0x2c   :  { %v621_v13 = vld [vmem:[#allocation2 + $0x30] sm:$0xff]   ;;  %v622_v15 = vld [vmem:[#allocation2 + $0x38] sm:$0xff]   ;;  %p674_p5 = por %p673_p4, %p672_p3 }
  0x2d   :  { %556 = vmatpush3.bf16.msra.mxu0 %v608_v1  ;;  %594 = vmatpush3.bf16.msra.mxu1 %v608_v1 }
  0x2e   :  { %557 = vmatprep.subr.bf16.mxu0 %v609_v2  ;;  %587 = vmatprep.subr.bf16.mxu1 %v609_v2  ;;  %p675_p6 = pnand %p674_p5, %p668_p2 }
  0x31   :  { %558 = vmatpush3.bf16.msra.mxu0 %v609_v2  ;;  %595 = vmatpush3.bf16.msra.mxu1 %v609_v2 }
  0x32   :  { %559 = vmatprep.subr.bf16.mxu0 %v610_v3  ;;  %588 = vmatprep.subr.bf16.mxu1 %v610_v3 }
  0x35   :  { %560 = vmatpush3.bf16.msra.mxu0 %v610_v3  ;;  %596 = vmatpush3.bf16.msra.mxu1 %v610_v3 }
  0x36   :  { %561 = vmatprep.subr.bf16.mxu0 %v611_v5  ;;  %589 = vmatprep.subr.bf16.mxu1 %v611_v5 }
  0x39   :  { %562 = vmatpush3.bf16.msra.mxu0 %v611_v5  ;;  %597 = vmatpush3.bf16.msra.mxu1 %v611_v5 }
  0x3a   :  { %563 = vmatprep.subr.bf16.mxu0 %v612_v7  ;;  %590 = vmatprep.subr.bf16.mxu1 %v612_v7 }
  0x3d   :  { %564 = vmatpush3.bf16.msra.mxu0 %v612_v7  ;;  %598 = vmatpush3.bf16.msra.mxu1 %v612_v7 }
  0x3e   :  { %565 = vmatprep.subr.bf16.mxu0 %v613_v8  ;;  %591 = vmatprep.subr.bf16.mxu1 %v613_v8 }
  0x41   :  { %566 = vmatpush3.bf16.msra.mxu0 %v613_v8  ;;  %599 = vmatpush3.bf16.msra.mxu1 %v613_v8 }
  0x42   :  { %567 = vmatprep.subr.bf16.mxu0 %v614_v9  ;;  %592 = vmatprep.subr.bf16.mxu1 %v614_v9 }
  0x45   :  { %568 = vmatpush3.bf16.msra.mxu0 %v614_v9  ;;  %600 = vmatpush3.bf16.msra.mxu1 %v614_v9 }
  0x48   :  { %570 = vmatmul.mubr.bf16.vlgmr.msra.gmra.mrb[0].mxu0 %v616_v10  ;;  %578 = vmatmul.mubr.bf16.vlgmr.msra.gmra.mrb[0].mxu1 %v620_v11 }
  0x49   :  { %573 = vmatprep.mubr.bf16.mxu0 %v617_v12  ;;  %581 = vmatprep.mubr.bf16.mxu1 %v621_v13 }
  0x50   :  { %574 = vmatmul.mubr.bf16.gmra.mrb[4].mxu0 %v618_v14  ;;  %582 = vmatmul.mubr.bf16.gmra.mrb[4].mxu1 %v622_v15 }
 0x11b   :  { %v571_v16 = vpop.f32.mrb[0].mxu0  ;;  %v775_v17 = vpop.f32.mrb[0].mxu1 }
 0x11c   :  { %v206_v18 = vpop.f32.mrb[1].mxu0  ;;  %v777_v19 = vpop.f32.mrb[1].mxu1  ;;  %v372_v31 = vmul.f32 %v571_v16, %v571_v16 }
 0x11d   :  { %v572_v20 = vpop.f32.mrb[2].mxu0  ;;  %v779_v21 = vpop.f32.mrb[2].mxu1  ;;  %v370_v22 = vmul.f32 %v206_v18, %v206_v18  ;;  %v378_v61 = vmul.f32 %v777_v19, %v777_v19 }
 0x11e   :  { %v498_v23 = vpack.c.bf16 %v572_v20, %v571_v16  ;;  %v209_v24 = vpop.f32.mrb[3].mxu0  ;;  %v518_v25 = vpack.c.bf16 %v779_v21, %v775_v17  ;;  %v783_v26 = vpop.f32.mrb[3].mxu1  ;;  %v373_v34 = vmul.f32 %v572_v20, %v572_v20 }
 0x11f   :  { %v493_v27 = vpack.c.bf16 %v209_v24, %v206_v18  ;;  %v349_v28 = vadd.f32 %v209_v24, %v206_v18  ;;  %v371_v29 = vmul.f32 %v209_v24, %v209_v24  ;;  %v513_v30 = vpack.c.bf16 %v783_v26, %v777_v19 }
 0x120   :  { %530 = vst [vmem:[#allocation7 + $0x8] sm:$0xff] %v498_v23   ;;  %534 = vst [vmem:[#allocation7 + $0x28] sm:$0xff] %v518_v25  }
 0x121   :  { %494 = vst [vmem:[#allocation7] sm:$0xff] %v493_v27   ;;  %v350_v32 = vadd.f32 %v571_v16, %v349_v28  ;;  %v386_v33 = vadd.f32 %v371_v29, %v370_v22  ;;  %533 = vst [vmem:[#allocation7 + $0x20] sm:$0xff] %v513_v30  }
 0x123   :  { %v387_v35 = vadd.f32 %v386_v33, %v372_v31  ;;  %v575_v36 = vpop.f32.mrb[4].mxu0  ;;  %v351_v37 = vadd.f32 %v572_v20, %v350_v32  ;;  %v583_v38 = vpop.f32.mrb[4].mxu1 }
 0x124   :  { %v222_v39 = vpop.f32.mrb[5].mxu0  ;;  %v254_v40 = vpop.f32.mrb[5].mxu1  ;;  %v376_v55 = vmul.f32 %v575_v36, %v575_v36 }
 0x125   :  { %v352_v41 = vadd.f32 %v351_v37, %v222_v39  ;;  %v374_v42 = vmul.f32 %v222_v39, %v222_v39  ;;  %v388_v43 = vadd.f32 %v387_v35, %v373_v34  ;;  %v576_v44 = vpop.f32.mrb[6].mxu0  ;;  %v584_v45 = vpop.f32.mrb[6].mxu1 }
 0x126   :  { %v508_v46 = vpack.c.bf16 %v576_v44, %v575_v36  ;;  %v225_v47 = vpop.f32.mrb[7].mxu0  ;;  %v528_v48 = vpack.c.bf16 %v584_v45, %v583_v38  ;;  %v257_v49 = vpop.f32.mrb[7].mxu1  ;;  %v377_v58 = vmul.f32 %v576_v44, %v576_v44 }
 0x127   :  { %v389_v50 = vadd.f32 %v388_v43, %v374_v42  ;;  %v503_v51 = vpack.c.bf16 %v225_v47, %v222_v39  ;;  %v353_v52 = vadd.f32 %v352_v41, %v225_v47  ;;  %v375_v53 = vmul.f32 %v225_v47, %v225_v47 }
 0x128   :  { %532 = vst [vmem:[#allocation7 + $0x18] sm:$0xff] %v508_v46   ;;  %536 = vst [vmem:[#allocation7 + $0x38] sm:$0xff] %v528_v48   ;;  %v523_v54 = vpack.c.bf16 %v257_v49, %v254_v40 }
 0x129   :  { %531 = vst [vmem:[#allocation7 + $0x10] sm:$0xff] %v503_v51   ;;  %v354_v56 = vadd.f32 %v575_v36, %v353_v52  ;;  %v390_v57 = vadd.f32 %v389_v50, %v375_v53 }
 0x12a   :  { %535 = vst [vmem:[#allocation7 + $0x30] sm:$0xff] %v523_v54  }
 0x12b   :  { %v391_v59 = vadd.f32 %v390_v57, %v376_v55  ;;  %v355_v60 = vadd.f32 %v576_v44, %v354_v56 }
 0x12c   :  { %678 = shalt.err (!%p675_p6)
}
 0x12d   :  { %s679_s14 = scalar_lea.hbm %s828_s2, 1024 }
 0x12e   :  { %p680_p7 = scmp.ne.s32.totalorder %s828_s2, %s679_s14  ;;  %p683_p8 = scmp.lt.u32.totalorder %s679_s14, %s828_s2 }
 0x130   :  { %p685_p9 = pnand %p683_p8, %p680_p7 }
 0x132   :  { %688 = shalt.err (!%p685_p9)
}
 0x133   :  { %421 = dma.vmem_to_hbm [thread:$0]  %s416_s10, 1024, %s828_s2, [#allocation4], %s720_s22, %s720_s22, %s721_s23   ;;  %v356_v62 = vadd.f32 %v355_v60, %v777_v19  ;;  %v392_v63 = vadd.f32 %v391_v59, %v377_v58  ;;  %v379_v2 = vmul.f32 %v783_v26, %v783_v26  ;;  %v380_v3 = vmul.f32 %v775_v17, %v775_v17 }
 0x134   :  { %v381_v6 = vmul.f32 %v779_v21, %v779_v21  ;;  %v382_v9 = vmul.f32 %v254_v40, %v254_v40  ;;  %v383_v14 = vmul.f32 %v257_v49, %v257_v49  ;;  %v384_v15 = vmul.f32 %v583_v38, %v583_v38  ;;  %s724_s2 = smov [#allocation8]  }
 0x135   :  { %v393_v0 = vadd.f32 %v392_v63, %v378_v61  ;;  %v357_v1 = vadd.f32 %v356_v62, %v783_v26  ;;  %v385_v19 = vmul.f32 %v584_v45, %v584_v45  ;;  %s428_s21 = sshll.u32 %s724_s2, 4  ;;  %vm407_vm0 = vcmask 1040384   ;;  %s429_s21 = int_to_ptr.vmem [resolvable:$true] %s428_s21 }
 0x136   :  { %s689_s22 = scalar_lea.vmem %s429_s21, 32  ;;  %p694_p11 = scmp.lt.s32.totalorder %s429_s21, %s429_s21 }
 0x137   :  { %v358_v4 = vadd.f32 %v775_v17, %v357_v1  ;;  %v394_v5 = vadd.f32 %v393_v0, %v379_v2  ;;  %p690_p10 = scmp.ne.s32.totalorder %s429_s21, %s689_s22  ;;  %p695_p12 = scmp.lt.s32.totalorder %s689_s22, %s689_s22 }
 0x139   :  { %v395_v7 = vadd.f32 %v394_v5, %v380_v3  ;;  %v359_v8 = vadd.f32 %v779_v21, %v358_v4  ;;  %p696_p13 = por %p695_p12, %p694_p11 }
 0x13b   :  { %v360_v10 = vadd.f32 %v359_v8, %v254_v40  ;;  %v396_v11 = vadd.f32 %v395_v7, %v381_v6  ;;  %p697_p0 = pnand %p696_p13, %p690_p10 }
 0x13d   :  { %v397_v12 = vadd.f32 %v396_v11, %v382_v9  ;;  %v361_v13 = vadd.f32 %v360_v10, %v257_v49 }
 0x13f   :  { %v362_v16 = vadd.f32 %v583_v38, %v361_v13  ;;  %v398_v18 = vadd.f32 %v397_v12, %v383_v14 }
 0x141   :  { %v363_v20 = vadd.f32 %v584_v45, %v362_v16  ;;  %v399_v22 = vadd.f32 %v398_v18, %v384_v15 }
 0x143   :  { %v364_v17 = vrot.slane %v363_v20, 4  ;;  %v400_v23 = vadd.f32 %v399_v22, %v385_v19 }
 0x145   :  { %v365_v24 = vadd.f32 %v364_v17, %v363_v20  ;;  %v401_v25 = vrot.slane %v400_v23, 4 }
 0x147   :  { %v366_v26 = vrot.slane %v365_v24, 2  ;;  %v402_v27 = vadd.f32 %v401_v25, %v400_v23 }
 0x149   :  { %v367_v28 = vadd.f32 %v366_v26, %v365_v24  ;;  %v403_v21 = vrot.slane %v402_v27, 2 }
 0x14b   :  { %v368_v29 = vrot.slane %v367_v28, 1  ;;  %v404_v30 = vadd.f32 %v403_v21, %v402_v27 }
 0x14d   :  { %v405_v31 = vrot.slane %v404_v30, 1  ;;  %v369_v32 = vadd.f32 %v368_v29, %v367_v28 }
 0x14f   :  { %v406_v33 = vadd.f32 %v405_v31, %v404_v30 }
 0x151   :  { %v408_v34 = vsel %vm407_vm0, %v369_v32, %v406_v33 }
 0x152   :  { %409 = vst [vmem:[#allocation8] sm:$0x3] %v408_v34 }
 0x153   :  { %700 = shalt.err (!%p697_p0)
}
 0x154   :  { %s701_s25 = scalar_lea.hbm %s829_s3, 32 }
 0x155   :  { %p702_p1 = scmp.ne.s32.totalorder %s829_s3, %s701_s25  ;;  %p705_p2 = scmp.lt.u32.totalorder %s701_s25, %s829_s3 }
 0x157   :  { %p707_p3 = pnand %p705_p2, %p702_p1 }
 0x159   :  { %710 = shalt.err (!%p707_p3)
}
 0x15a   :  { %431 = dma.vmem_to_hbm [thread:$0]  %s429_s21, 32, %s829_s3, [#allocation9]  }
 0x15b   :  { %715 = dma.done.wait [#allocation4], 1024  }
 0x15c   :  { %716 = vsyncadd [#allocation4], 4294966272 }
 0x15d   :  { %717 = dma.done.wait [#allocation9], 32  }
 0x15e   :  { %718 = vsyncadd [#allocation9], 4294967264 }
 0x15f   :  { %438 = vsyncpa [#allocation3], 1 }
 0x160   :  { %439 = vsyncpa [#allocation6], 1 }
 0x161   :  { %440 = vsyncpa [#allocation4], 1 }
 0x162   :  { %441 = vsyncpa [#allocation9], 1 }

</bundles_post_ra>
